<compile_context>
chip_gen: v5e
topology: v5e:2x2
jax: 0.10.0
libtpu: 0.0.40
codegen_flags: <defaults>
</compile_context>

<pallas_src>
import functools

import jax
import jax.numpy as jnp
from jax.experimental import pallas as pl
from jax.experimental.pallas import tpu as pltpu


def _round_up(x, n):
    return ((x + n - 1) // n) * n


# ---------------------------------------------------------------------------
# Kernel 1: transposed im2col GEMM, fused LeakyReLU + BN partial statistics
#   w_ref:     (C_out, K)        full weight matrix (resident across the grid)
#   a_ref:     (K, tm)           im2col patch tile (M on lanes)
#   o_ref:     (C_out, tm)       post-LeakyReLU activation tile (lane dense)
#   stats_ref: (1, C_out, 2)     per-tile [sum, sumsq] per output channel
# ---------------------------------------------------------------------------
def _conv_gemm_lrelu_stats_kernel(w_ref, a_ref, o_ref, stats_ref, *,
                                  negative_slope):
    y = jnp.dot(w_ref[...], a_ref[...], preferred_element_type=jnp.float32)
    y = jnp.where(y >= 0, y, y * negative_slope)          # LeakyReLU(0.2), f32
    o_ref[...] = y.astype(o_ref.dtype)

    # BN partial stats (f32). Padded M columns (zero patches through a bias-free
    # conv + LeakyReLU) are exact zeros, so they contribute nothing — no mask.
    s1 = jnp.sum(y, axis=1, keepdims=True)                # (C_out, 1)
    s2 = jnp.sum(y * y, axis=1, keepdims=True)            # (C_out, 1)
    stats_ref[0] = jnp.concatenate([s1, s2], axis=1)      # (C_out, 2)


# ---------------------------------------------------------------------------
# Kernel 2: BatchNorm apply (y * scale + shift), tiled over M, lane dense,
# writes in place over the GEMM output (input_output_aliases).
# ---------------------------------------------------------------------------
def _bn_apply_kernel(y_ref, scale_ref, shift_ref, o_ref):
    y = y_ref[...].astype(jnp.float32)
    o_ref[...] = (y * scale_ref[...] + shift_ref[...]).astype(o_ref.dtype)


# ---------------------------------------------------------------------------
# im2col emitted directly in GEMM-friendly (K, M) layout.
#   K ordered (C_in, kh, kw)  -> matches PyTorch OIHW weight.reshape(C_out, K)
#   M ordered (N, Hout, Wout) -> lane-dense, minor dims untouched by transpose
# ---------------------------------------------------------------------------
def _im2col_T(x, kh, kw, stride, pad):
    n, c, h, w = x.shape
    xp = jnp.pad(x, ((0, 0), (0, 0), (pad, pad), (pad, pad)))
    h_out = (h + 2 * pad - kh) // stride + 1
    w_out = (w + 2 * pad - kw) // stride + 1
    cols = []
    for i in range(kh):
        for j in range(kw):
            cols.append(xp[:, :, i:i + stride * h_out:stride,
                              j:j + stride * w_out:stride])   # (N,C,Hout,Wout)
    cols = jnp.stack(cols, axis=0).reshape(kh, kw, n, c, h_out, w_out)
    cols = cols.transpose(3, 0, 1, 2, 4, 5)      # (C,kh,kw,N,Hout,Wout) — minor
    return cols.reshape(c * kh * kw, n * h_out * w_out), h_out, w_out


def _choose_tm(m, k, c_out, elem_bytes, tm_target, vmem_budget=24 * 1024 * 1024):
    """Largest lane-dense M tile that keeps double-buffered tiles in budget."""
    per_col = 2 * (k + c_out) * elem_bytes          # double-buffered A + out tile
    fixed = 2 * c_out * k * elem_bytes              # weight (counted 2x for safety)
    cap = max(128, ((vmem_budget - fixed) // max(per_col, 1)) // 128 * 128)
    return max(128, min(tm_target, _round_up(m, 128), cap))


# ---------------------------------------------------------------------------
# ConvBlock forward
# ---------------------------------------------------------------------------
def conv_block(x, weight, gamma=None, beta=None, *, stride=2, pad=1,
               negative_slope=0.2, eps=1e-5, has_batch_norm=True,
               tm_target=512, gemm_dtype=None):
    n, c_in, h, w = x.shape
    c_out, _, kh, kw = weight.shape
    k = c_in * kh * kw

    a_t, h_out, w_out = _im2col_T(x, kh, kw, stride, pad)    # (K, M)
    m = a_t.shape[1]

    w_t = weight.reshape(c_out, k)                            # (C_out, K)
    if gemm_dtype is not None:                                # e.g. bf16 on v6e/v7x
        a_t = a_t.astype(gemm_dtype)
        w_t = w_t.astype(gemm_dtype)

    elem_bytes = max(jnp.dtype(a_t.dtype).itemsize, jnp.dtype(x.dtype).itemsize)
    tm = _choose_tm(m, k, c_out, elem_bytes, tm_target)
    m_pad = _round_up(m, tm)
    if m_pad != m:
        a_t = jnp.pad(a_t, ((0, 0), (0, m_pad - m)))
    grid_m = m_pad // tm

    bytes_acc = (int(a_t.size) * jnp.dtype(a_t.dtype).itemsize
                 + int(w_t.size) * jnp.dtype(w_t.dtype).itemsize
                 + c_out * m_pad * jnp.dtype(x.dtype).itemsize
                 + grid_m * c_out * 2 * 4)

    gemm = pl.pallas_call(
        functools.partial(_conv_gemm_lrelu_stats_kernel,
                          negative_slope=negative_slope),
        out_shape=(jax.ShapeDtypeStruct((c_out, m_pad), x.dtype),
                   jax.ShapeDtypeStruct((grid_m, c_out, 2), jnp.float32)),
        grid_spec=pltpu.PrefetchScalarGridSpec(
            num_scalar_prefetch=0,
            grid=(grid_m,),
            in_specs=[pl.BlockSpec((c_out, k), lambda i: (0, 0)),
                      pl.BlockSpec((k, tm), lambda i: (0, i))],
            out_specs=[pl.BlockSpec((c_out, tm), lambda i: (0, i)),
                       pl.BlockSpec((1, c_out, 2), lambda i: (i, 0, 0))]),
        compiler_params=pltpu.CompilerParams(
            dimension_semantics=("parallel",),
            vmem_limit_bytes=32 * 1024 * 1024),
        cost_estimate=pl.CostEstimate(flops=2 * c_out * k * m_pad,
                                      transcendentals=0,
                                      bytes_accessed=bytes_acc),
    )
    y, stats = gemm(w_t, a_t)          # y: (C_out, m_pad), stats: (grid_m, C_out, 2)

    if not has_batch_norm:
        out_cmaj = y
    else:
        # Tiny per-channel reduction / affine folding on (grid_m, C_out, 2).
        tot = jnp.sum(stats, axis=0)                          # (C_out, 2)
        mean = tot[:, 0] / m
        var = jnp.maximum(tot[:, 1] / m - mean * mean, 0.0)   # biased variance
        inv_std = jax.lax.rsqrt(var + eps)
        scale = gamma.astype(jnp.float32) * inv_std
        shift = beta.astype(jnp.float32) - mean * scale
        # TODO(synk): PyTorch BN also updates running_mean/running_var buffers
        # in training mode; that stateful side effect is not emitted here.

        bn = pl.pallas_call(
            _bn_apply_kernel,
            out_shape=jax.ShapeDtypeStruct((c_out, m_pad), x.dtype),
            grid_spec=pltpu.PrefetchScalarGridSpec(
                num_scalar_prefetch=0,
                grid=(grid_m,),
                in_specs=[pl.BlockSpec((c_out, tm), lambda i: (0, i)),
                          pl.BlockSpec((c_out, 1), lambda i: (0, 0)),
                          pl.BlockSpec((c_out, 1), lambda i: (0, 0))],
                out_specs=pl.BlockSpec((c_out, tm), lambda i: (0, i))),
            compiler_params=pltpu.CompilerParams(
                dimension_semantics=("parallel",)),
            input_output_aliases={0: 0},          # normalize y in place
        )
        out_cmaj = bn(y, scale.reshape(c_out, 1), shift.reshape(c_out, 1))

    # (C_out, M) -> NCHW: slice off pad (if any) + cheap leading-axis permute.
    out = out_cmaj[:, :m].reshape(c_out, n, h_out, w_out)
    return out.transpose(1, 0, 2, 3)


# ---------------------------------------------------------------------------
# Pure-JAX reference
# ---------------------------------------------------------------------------
def _reference(x, weight, gamma, beta, eps=1e-5, slope=0.2):
    y = jax.lax.conv_general_dilated(
        x, weight, (2, 2), [(1, 1), (1, 1)],
        dimension_numbers=("NCHW", "OIHW", "NCHW"))
    y = jnp.where(y >= 0, y, slope * y)
    mean = y.mean(axis=(0, 2, 3), keepdims=True)
    var = y.var(axis=(0, 2, 3), keepdims=True)
    y = (y - mean) * jax.lax.rsqrt(var + eps)
    return y * gamma.reshape(1, -1, 1, 1) + beta.reshape(1, -1, 1, 1)


if __name__ == "__main__":
    key = jax.random.PRNGKey(0)
    kx, kw = jax.random.split(key)

    N, F_IN, F_OUT, S = 2, 4, 8, 16
    x = jax.random.normal(kx, (N, F_IN, S, S), dtype=jnp.float32)
    # Conv2d(f_in=4, f_out=8, kernel=4, stride=2, pad=1, bias=False) weight (OIHW)
    weight = 0.05 * jax.random.normal(kw, (F_OUT, F_IN, 4, 4), dtype=jnp.float32)
    # BatchNorm2d default init
    gamma = jnp.ones((F_OUT,), dtype=jnp.float32)
    beta = jnp.zeros((F_OUT,), dtype=jnp.float32)

    out = conv_block(x, weight, gamma, beta)
    out = jax.block_until_ready(out)

    ref = _reference(x, weight, gamma, beta)
    assert out.shape == (N, F_OUT, S // 2, S // 2), out.shape
    assert jnp.allclose(out, ref, rtol=2e-2, atol=2e-2), \
        float(jnp.max(jnp.abs(out - ref)))

    print("KERNEL_OK")
</pallas_src>

<mosaic_0001>
module attributes {stable_mosaic.version = 11 : i64} {
  func.func @_conv_gemm_lrelu_stats_kernel(%arg0: i32, %arg1: memref<8x64xf32, #tpu.memory_space<vmem>>, %arg2: memref<64x128xf32, #tpu.memory_space<vmem>>, %arg3: memref<8x128xf32, #tpu.memory_space<vmem>>, %arg4: memref<1x8x2xf32, #tpu.memory_space<vmem>>) attributes {dimension_semantics = [#tpu.dimension_semantics<parallel>], iteration_bounds = array<i64: 1>, scalar_prefetch = 0 : i64, scratch_operands = 0 : i64, tpu.core_type = #tpu.core_type<tc>, window_params = [{pipeline_mode = #tpu.pipeline_mode<synchronous>, transform_indices = @transform_0, window_bounds = array<i64: 8, 64>}, {transform_indices = @transform_1, window_bounds = array<i64: 64, 128>}, {transform_indices = @transform_2, window_bounds = array<i64: 8, 128>}, {transform_indices = @transform_3, window_bounds = array<i64: 1, 8, 2>}]} {
    %c0 = arith.constant 0 : index
    %c0_0 = arith.constant 0 : index
    %0 = vector.load %arg1[%c0, %c0_0] : memref<8x64xf32, #tpu.memory_space<vmem>>, vector<8x64xf32>
    %c0_1 = arith.constant 0 : index
    %c0_2 = arith.constant 0 : index
    %1 = vector.load %arg2[%c0_1, %c0_2] : memref<64x128xf32, #tpu.memory_space<vmem>>, vector<64x128xf32>
    %cst = arith.constant dense<0.000000e+00> : vector<8x128xf32>
    %2 = tpu.matmul %0, %1, %cst {dimension_numbers = #tpu.dot_dimension_numbers<[1], [0], [0], [1], [0, 0, 1, 1], [], []>} : vector<8x64xf32>, vector<64x128xf32>, vector<8x128xf32> -> vector<8x128xf32>
    %cst_3 = arith.constant 0.000000e+00 : f32
    %3 = vector.broadcast %cst_3 : f32 to vector<8x128xf32>
    %4 = arith.cmpf oge, %2, %3 : vector<8x128xf32>
    %cst_4 = arith.constant 2.000000e-01 : f32
    %5 = vector.broadcast %cst_4 : f32 to vector<8x128xf32>
    %6 = arith.mulf %2, %5 : vector<8x128xf32>
    %7 = arith.select %4, %2, %6 : vector<8x128xi1>, vector<8x128xf32>
    %c0_5 = arith.constant 0 : index
    %c0_6 = arith.constant 0 : index
    %8 = vector.load %arg3[%c0_5, %c0_6] : memref<8x128xf32, #tpu.memory_space<vmem>>, vector<8x128xf32>
    tpu.vector_store %arg3[%c0_5, %c0_6], %7 {strides = array<i32>} : memref<8x128xf32, #tpu.memory_space<vmem>>, vector<8x128xf32>,
    %cst_7 = arith.constant dense<0.000000e+00> : vector<8xf32>
    %9 = vector.multi_reduction <add>, %7, %cst_7 [1] : vector<8x128xf32> to vector<8xf32>
    %10 = vector.shape_cast %9 : vector<8xf32> to vector<8x1xf32>
    %11 = arith.mulf %7, %7 : vector<8x128xf32>
    %cst_8 = arith.constant dense<0.000000e+00> : vector<8xf32>
    %12 = vector.multi_reduction <add>, %11, %cst_8 [1] : vector<8x128xf32> to vector<8xf32>
    %13 = vector.shape_cast %12 : vector<8xf32> to vector<8x1xf32>
    %14 = tpu.concatenate %10, %13 in 1 : vector<8x1xf32>, vector<8x1xf32> -> vector<8x2xf32>
    %c0_9 = arith.constant 0 : index
    %c0_10 = arith.constant 0 : index
    %c0_11 = arith.constant 0 : index
    %15 = vector.load %arg4[%c0_9, %c0_10, %c0_11] : memref<1x8x2xf32, #tpu.memory_space<vmem>>, vector<1x8x2xf32>
    %16 = vector.shape_cast %15 : vector<1x8x2xf32> to vector<8x2xf32>
    %17 = vector.shape_cast %14 : vector<8x2xf32> to vector<1x8x2xf32>
    tpu.vector_store %arg4[%c0_9, %c0_10, %c0_11], %17 {strides = array<i32>} : memref<1x8x2xf32, #tpu.memory_space<vmem>>, vector<1x8x2xf32>,
    return
  }
  func.func @transform_0(%arg0: i32) -> (i32, i32) {
    %c0_i32 = arith.constant 0 : i32
    %c0_i32_0 = arith.constant 0 : i32
    %c0_i32_1 = arith.constant 0 : i32
    return %c0_i32, %c0_i32_0 : i32, i32
  }
  func.func @transform_1(%arg0: i32) -> (i32, i32) {
    %c0_i32 = arith.constant 0 : i32
    %c0_i32_0 = arith.constant 0 : i32
    return %c0_i32, %arg0 : i32, i32
  }
  func.func @transform_2(%arg0: i32) -> (i32, i32) {
    %c0_i32 = arith.constant 0 : i32
    %c0_i32_0 = arith.constant 0 : i32
    return %c0_i32, %arg0 : i32, i32
  }
  func.func @transform_3(%arg0: i32) -> (i32, i32, i32) {
    %c0_i32 = arith.constant 0 : i32
    %c0_i32_0 = arith.constant 0 : i32
    %c0_i32_1 = arith.constant 0 : i32
    return %arg0, %c0_i32, %c0_i32_0 : i32, i32, i32
  }
}

</mosaic_0001>

<bundles_post_ra>
// kernel: tpu_custom_call.1
= control target key start
LH: loop header
LB: loop body
LE: loop exit
PB: predicated region body
PF: predicated region fallthrough
CT: control target
= control target key end

     0   :  { %9 = vsyncpa [#allocation3], 0  ;;  %s233_s0 = inlined_call_operand.hbm [shape: f32[8,64], index: 0, kind: input, shape index: {}]   ;;  %s234_s1 = inlined_call_operand.hbm [shape: f32[64,128], index: 1, kind: input, shape index: {}]   ;;  %s235_s2 = inlined_call_operand.hbm [shape: f32[8,128], index: 2, kind: output, shape index: {0}]   ;;  %s236_s3 = inlined_call_operand.vmem [shape: f32[1,8,2], index: 3, kind: output, shape index: {1}]  }
   0x1   :  { %10 = vsyncpa [#allocation6], 0 }
   0x2   :  { %11 = vsyncpa [#allocation4], 0  ;;  %s17_s14 = sshll.u32 %s233_s0, 4  ;;  %s196_s15 = smov [#allocation2]   ;;  %s18_s14 = int_to_ptr.hbm [resolvable:$true] %s17_s14 }
   0x3   :  { %s19_s16 = sshll.u32 %s196_s15, 4  ;;  %s27_s19 = sshll.u32 %s234_s1, 4  ;;  %s20_s16 = int_to_ptr.vmem [resolvable:$true] %s19_s16  ;;  %s28_s19 = int_to_ptr.hbm [resolvable:$true] %s27_s19 }
   0x4   :  { %22 = dma.hbm_to_vmem [thread:$0]  %s18_s14, 128, %s20_s16, [#allocation3]  }
   0x5   :  { %s197_s20 = smov [#allocation5]   ;;  %s198_s22 = smov 128  }
   0x6   :  { %s29_s21 = sshll.u32 %s197_s20, 4  ;;  %s199_s23 = smov 8   ;;  %s30_s21 = int_to_ptr.vmem [resolvable:$true] %s29_s21 }
   0x7   :  { %35 = dma.hbm_to_vmem [thread:$0]  %s28_s19, 1024, %s30_s21, [#allocation6], %s198_s22, %s198_s22, %s199_s23  }
   0x8   :  { %190 = dma.done.wait [#allocation3], 128  }
   0x9   :  { %191 = vsyncadd [#allocation3], 4294967168 }
   0xa   :  { %192 = dma.done.wait [#allocation6], 1024  }
   0xb   :  { %193 = vsyncadd [#allocation6], 4294966272  ;;  %v52_v0 = vld [vmem:[#allocation5 + $0x38] sm:$0xff]  ;;  %v51_v1 = vld [vmem:[#allocation5 + $0x30] sm:$0xff]  ;;  %vm53_vm0 = vcmask 523264   ;;  %s200_s0 = smov [#allocation7]  }
   0xc   :  { %65 = vmatpush.msra.mxu0 %v52_v0  ;;  %v50_v2 = vld [vmem:[#allocation5 + $0x28] sm:$0xff]  ;;  %v49_v3 = vld [vmem:[#allocation5 + $0x20] sm:$0xff]  ;;  %v48_v4 = vld [vmem:[#allocation5 + $0x18] sm:$0xff]  ;;  %s95_s1 = sshll.u32 %s200_s0, 4  ;;  %s97_s26 = sshll.u32 %s235_s2, 4  ;;  %vm86_vm2 = vcmask 7168   ;;  %s96_s1 = int_to_ptr.vmem [resolvable:$true] %s95_s1  ;;  %s98_s26 = int_to_ptr.hbm [resolvable:$true] %s97_s26 }
   0xd   :  { %v47_v5 = vld [vmem:[#allocation5 + $0x10] sm:$0xff]  ;;  %v46_v6 = vld [vmem:[#allocation5 + $0x8] sm:$0xff]  ;;  %v45_v7 = vld [vmem:[#allocation5] sm:$0xff]  ;;  %vm88_vm3 = vcmask 15360  }
   0xe   :  { %66 = vmatpush.msra.mxu0 %v51_v1  ;;  %v44_v8 = vld [vmem:[#allocation2] sm:$0xff] }
  0x10   :  { %67 = vmatpush.msra.mxu0 %v50_v2 }
  0x12   :  { %68 = vmatpush.msra.mxu0 %v49_v3 }
  0x14   :  { %69 = vmatpush.msra.mxu0 %v48_v4 }
  0x16   :  { %70 = vmatpush.msra.mxu0 %v47_v5 }
  0x18   :  { %71 = vmatpush.msra.mxu0 %v46_v6 }
  0x1a   :  { %72 = vmatpush.msra.mxu0 %v45_v7 }
  0x1b   :  { %112 = vmatmul.msk.f32.vlgmr.msra.gmra.mxu0 %vm53_vm0, %v44_v8 }
  0x98   :  { %v74_v9 = vpop.f32.mrf.mxu0 }
  0x99   :  { %vm77_vm1 = vcmp.ge.f32.partialorder %v74_v9, 0.0  ;;  %v78_v10 = vmul.f32 0.2, %v74_v9 }
  0x9b   :  { %v79_v11 = vsel %vm77_vm1, %v74_v9, %v78_v10 }
  0x9c   :  { %81 = vadd.xlane.f32.xlu0 %v79_v11  ;;  %80 = vst [vmem:[#allocation7] sm:$0xff] %v79_v11  ;;  %v83_v12 = vmul.f32 %v79_v11, %v79_v11 }
  0x9d   :  { %100 = dma.vmem_to_hbm [thread:$0]  %s96_s1, 128, %s98_s26, [#allocation4]  }
  0xa4   :  { %84 = vadd.xlane.f32.xlu0 %v83_v12 }
 0x10f   :  { %v82_v13 = vpop.xlane.xlu0 %81 }
 0x117   :  { %v85_v14 = vpop.xlane.xlu0 %84 }
 0x118   :  { %v87_v15 = vsel %vm86_vm2, %v82_v13, %v85_v14 }
 0x119   :  { %89 = vst.msk [vmem:[%s236_s3] sm:$0xff] %vm88_vm3, %v87_v15 }
 0x11a   :  { %194 = dma.done.wait [#allocation4], 128  }
 0x11b   :  { %195 = vsyncadd [#allocation4], 4294967168 }
 0x11c   :  { %109 = vsyncpa [#allocation3], 1 }
 0x11d   :  { %110 = vsyncpa [#allocation6], 1 }
 0x11e   :  { %111 = vsyncpa [#allocation4], 1 }

</bundles_post_ra>
